<compile_context>
chip_gen: v7x
topology: tpu7x:2x2x1
jax: 0.10.0
libtpu: 0.0.40
codegen_flags: <defaults>
</compile_context>

<pallas_src>
import functools
import math

import jax
import jax.numpy as jnp
from jax.experimental import pallas as pl
from jax.experimental.pallas import tpu as pltpu

EPS = 1e-06
LOG_EPS = math.log(EPS)
_LANE = 128


def _round_up(x, m):
    return ((x + m - 1) // m) * m


def _cdiv(a, b):
    return (a + b - 1) // b


def _tpu_info():
    try:
        return pltpu.get_tpu_info()
    except Exception:
        return None


def js_kernel(pred_ref, labels_ref, out_ref, acc_ref, *, pi, scale, n_valid,
              block_batch, inner_steps, class_axis):
    """Processes one batch tile; accumulates per-sample JS into acc_ref.

    class_axis == 0: pred block (C, TB), labels (1, TB)  [lane-dense batch]
    class_axis == 1: pred block (TB, C), labels (TB, 1)  [large-C layout]
    Grid = (num_parallel, inner_steps): axis 0 'parallel', axis 1 'arbitrary'.
    """
    batch_axis = 1 - class_axis
    p_idx = pl.program_id(0)
    i = pl.program_id(1)

    @pl.when(i == 0)
    def _init():
        acc_ref[...] = jnp.zeros_like(acc_ref)

    logits = pred_ref[...].astype(jnp.float32)
    labels = labels_ref[...]                               # int32

    w0 = jnp.float32(pi)
    w1 = jnp.float32(1.0 - pi)
    log_w1 = jnp.float32(math.log(1.0 - pi))
    log_eps = jnp.float32(LOG_EPS)

    onehot = jax.lax.broadcasted_iota(jnp.int32, logits.shape, class_axis) == labels

    # --- softmax / log-softmax: one full-width exp; all logs per-sample-width
    mx = jnp.max(logits, axis=class_axis, keepdims=True)
    shifted = logits - mx
    ex = jnp.exp(shifted)
    sum_ex = jnp.sum(ex, axis=class_axis, keepdims=True)
    inv_sum = pl.reciprocal(sum_ex)                        # exact; per-sample
    probs = ex * inv_sum
    log_probs = shifted - jnp.log(sum_ex)                  # log_softmax

    # mean distribution log:
    #   label column : log(pi + (1-pi)*p_label)   (never EPS-clipped, pi>=EPS)
    #   other columns: log(clip((1-pi)*p, EPS, 1)) == max(log(1-pi)+log_p, logEPS)
    p_label = jnp.sum(jnp.where(onehot, probs, 0.0), axis=class_axis, keepdims=True)
    mean_log_label = jnp.log(w0 + w1 * p_label)            # per-sample log
    mean_log = jnp.where(onehot, mean_log_label,
                         jnp.maximum(log_w1 + log_probs, log_eps))

    # KL(one-hot || mean) per sample == -mean_log[label]
    kl_onehot = -mean_log_label

    # KL(softmax || mean) per sample
    logp_cl = jnp.maximum(log_probs, log_eps)              # log(max(p, EPS))
    kl_p_terms = jnp.where(probs > 0, probs * (logp_cl - mean_log), 0.0)
    kl_p = jnp.sum(kl_p_terms, axis=class_axis, keepdims=True)

    per_sample = w0 * kl_onehot + w1 * kl_p                # (1,TB) or (TB,1)

    # mask padded samples (ragged last tile / padded parallel slice)
    samp0 = (p_idx * inner_steps + i) * block_batch
    samp = samp0 + jax.lax.broadcasted_iota(jnp.int32, per_sample.shape, batch_axis)
    acc_ref[...] += jnp.where(samp < n_valid, per_sample, 0.0)

    @pl.when(i == pl.num_programs(1) - 1)
    def _finalize():
        total = jnp.sum(acc_ref[...]) * jnp.float32(scale / n_valid)
        lane = jax.lax.broadcasted_iota(jnp.int32, (1, _LANE), 1)
        out_ref[...] = jnp.where(lane == 0, total, 0.0)    # lane-dense store


def js_loss(pred, labels, num_classes, pi, *, pred_tile_bytes=None,
            small_c_threshold=128, num_parallel=None, interpret=False):
    """Pallas implementation of JS(num_classes, pi).forward(pred, labels)."""
    n, c = pred.shape
    assert c == num_classes
    # pi >= EPS guarantees the label column of the mean distribution is never
    # EPS-clipped (used algebraically in the kernel); pi < 1 for `scale`.
    assert EPS <= pi < 1.0, "require EPS <= pi < 1"
    scale = -1.0 / ((1.0 - pi) * math.log(1.0 - pi))

    info = _tpu_info()
    if num_parallel is None:
        num_parallel = 2
        if info is not None:
            try:  # best-effort: 2 TensorCores only on megacore generations
                num_parallel = int(getattr(info, "num_cores", 2))
            except Exception:
                num_parallel = 2
        num_parallel = max(1, min(2, num_parallel))

    if pred_tile_bytes is None:
        vmem_cap = 64 << 20
        if info is not None:
            try:
                vmem_cap = int(getattr(info, "vmem_capacity_bytes", vmem_cap))
            except Exception:
                pass
        # ~8 MiB/tile on v5e/v6e (128 MiB VMEM), ~4 MiB on v7x (64 MiB VMEM)
        pred_tile_bytes = max(1 << 20, min(8 << 20, vmem_cap // 16))

    itemsize = jnp.dtype(pred.dtype).itemsize
    sub = 32 // itemsize                                   # sublane packing
    labels_i32 = labels.astype(jnp.int32)

    if c <= small_c_threshold:
        # ---- small C: transposed (C, N) layout, batch on the 128-lane axis --
        col_bytes = _round_up(c, sub) * itemsize           # VMEM bytes / sample (pred)
        blk = max(_LANE, (pred_tile_bytes // max(col_bytes, 1)) // _LANE * _LANE)
        blk = min(blk, _round_up(_cdiv(n, num_parallel), _LANE))
        n_pad = _round_up(n, blk * num_parallel)
        inner_steps = n_pad // (blk * num_parallel)

        pred_in = jnp.pad(pred.T, ((0, 0), (0, n_pad - n)))
        lab_in = jnp.pad(labels_i32.reshape(1, n), ((0, 0), (0, n_pad - n)))
        pred_spec = pl.BlockSpec((c, blk), lambda p, i: (0, p * inner_steps + i))
        lab_spec = pl.BlockSpec((1, blk), lambda p, i: (0, p * inner_steps + i))
        acc_shape = (1, blk)
        class_axis = 0
        pred_buf = _round_up(c, sub) * blk * itemsize
        lab_buf = 8 * blk * 4
        acc_buf = 8 * blk * 4
    else:
        # ---- large C: keep (N, C), class axis on lanes; labels stay (TB, 1)
        # (their 128x lane padding is charged to the byte budget).
        row_bytes = _round_up(c, _LANE) * itemsize + _LANE * 4
        blk = max(16, (pred_tile_bytes // row_bytes) // 16 * 16)
        blk = min(blk, _round_up(_cdiv(n, num_parallel), 16))
        n_pad = _round_up(n, blk * num_parallel)
        inner_steps = n_pad // (blk * num_parallel)

        pred_in = jnp.pad(pred, ((0, n_pad - n), (0, 0)))
        lab_in = jnp.pad(labels_i32.reshape(n, 1), ((0, n_pad - n), (0, 0)))
        pred_spec = pl.BlockSpec((blk, c), lambda p, i: (p * inner_steps + i, 0))
        lab_spec = pl.BlockSpec((blk, 1), lambda p, i: (p * inner_steps + i, 0))
        acc_shape = (blk, 1)
        class_axis = 1
        pred_buf = blk * _round_up(c, _LANE) * itemsize
        lab_buf = blk * _LANE * 4
        acc_buf = blk * _LANE * 4

    # VMEM limit sized from the actual (double-buffered) buffers + headroom.
    vmem_need = 2 * pred_buf + 2 * lab_buf + acc_buf + (2 << 20)
    vmem_limit = int(min(max(vmem_need * 1.25, 16 << 20), 48 << 20))

    cost = pl.CostEstimate(
        flops=16 * n_pad * c,
        transcendentals=n_pad * c + 3 * n_pad,
        bytes_accessed=n_pad * c * itemsize + n_pad * 4 + num_parallel * _LANE * 4,
    )

    kernel = functools.partial(
        js_kernel, pi=float(pi), scale=float(scale), n_valid=n,
        block_batch=blk, inner_steps=inner_steps, class_axis=class_axis)

    partials = pl.pallas_call(
        kernel,
        out_shape=jax.ShapeDtypeStruct((1, num_parallel * _LANE), jnp.float32),
        grid_spec=pltpu.PrefetchScalarGridSpec(
            num_scalar_prefetch=0,
            grid=(num_parallel, inner_steps),
            in_specs=[pred_spec, lab_spec],
            out_specs=pl.BlockSpec((1, _LANE), lambda p, i: (0, p)),
            scratch_shapes=[pltpu.VMEM(acc_shape, jnp.float32)],
        ),
        compiler_params=pltpu.CompilerParams(
            dimension_semantics=("parallel", "arbitrary"),
            vmem_limit_bytes=vmem_limit),
        cost_estimate=cost,
        interpret=interpret,
    )(pred_in, lab_in)
    # partials: lane 0 of each per-core 128-lane slab holds that slice's sum.
    return jnp.sum(partials)


def js_loss_ref(pred, labels, num_classes, pi):
    """Pure-JAX reference mirroring the PyTorch module exactly."""
    weights = [pi, 1.0 - pi]
    scale = -1.0 / ((1.0 - pi) * math.log(1.0 - pi))
    p = jax.nn.softmax(pred.astype(jnp.float32), axis=1)
    onehot = jax.nn.one_hot(labels, num_classes, dtype=jnp.float32)
    distribs = [onehot, p]
    mean_d = sum(w * d for w, d in zip(weights, distribs))
    mean_log = jnp.log(jnp.clip(mean_d, EPS, 1.0))

    def ckl(target):
        out_pos = target * (jnp.log(jnp.maximum(target, EPS)) - mean_log)
        out = jnp.where(target > 0, out_pos, jnp.zeros_like(out_pos))
        return jnp.mean(jnp.sum(out, axis=1))

    jsw = sum(w * ckl(d) for w, d in zip(weights, distribs))
    return scale * jsw


if __name__ == "__main__":
    # --- small-C path (transposed, lane-dense batch), f32 logits -------------
    num_classes = 10
    batch = 12   # not a multiple of the tile -> exercises sample masking

    key = jax.random.PRNGKey(0)
    kp, kl_key = jax.random.split(key)
    pred = jax.random.normal(kp, (batch, num_classes), dtype=jnp.float32)
    labels = jax.random.randint(kl_key, (batch,), 0, num_classes, dtype=jnp.int32)

    for pi in (0.5, 0.3):
        out = jax.block_until_ready(js_loss(pred, labels, num_classes, pi))
        ref = js_loss_ref(pred, labels, num_classes, pi)
        assert jnp.allclose(out, ref, atol=5e-5, rtol=5e-5), (pi, float(out), float(ref))

    # --- large-C path ((N, C) layout), bf16 logits ----------------------------
    num_classes2, batch2 = 384, 40
    kp2, kl2 = jax.random.split(kl_key)
    pred2 = jax.random.normal(kp2, (batch2, num_classes2), dtype=jnp.bfloat16)
    labels2 = jax.random.randint(kl2, (batch2,), 0, num_classes2, dtype=jnp.int32)
    out2 = jax.block_until_ready(js_loss(pred2, labels2, num_classes2, 0.5))
    ref2 = js_loss_ref(pred2.astype(jnp.float32), labels2, num_classes2, 0.5)
    assert jnp.allclose(out2, ref2, atol=1e-4, rtol=1e-4), (float(out2), float(ref2))

    print("KERNEL_OK")
</pallas_src>

<mosaic_0001>
module attributes {stable_mosaic.version = 11 : i64} {
  func.func @js_kernel(%arg0: i32, %arg1: i32, %arg2: memref<10x128xf32, #tpu.memory_space<vmem>>, %arg3: memref<1x128xi32, #tpu.memory_space<vmem>>, %arg4: memref<1x128xf32, #tpu.memory_space<vmem>>, %arg5: memref<1x128xf32, #tpu.memory_space<vmem>>) attributes {dimension_semantics = [#tpu.dimension_semantics<parallel>, #tpu.dimension_semantics<arbitrary>], iteration_bounds = array<i64: 2, 1>, scalar_prefetch = 0 : i64, scratch_operands = 1 : i64, tpu.core_type = #tpu.core_type<tc>, window_params = [{transform_indices = @transform_0, window_bounds = array<i64: 10, 128>}, {transform_indices = @transform_1, window_bounds = array<i64: 1, 128>}, {transform_indices = @transform_2, window_bounds = array<i64: 1, 128>}]} {
    %c0_i32 = arith.constant 0 : i32
    %0 = arith.cmpi eq, %arg1, %c0_i32 : i32
    %1 = arith.extui %0 : i1 to i32
    %c0_i32_0 = arith.constant 0 : i32
    %2 = arith.cmpi ne, %1, %c0_i32_0 : i32
    scf.if %2 {
      %cst_25 = arith.constant 0.000000e+00 : f32
      %70 = vector.broadcast %cst_25 : f32 to vector<1x128xf32>
      %c0_26 = arith.constant 0 : index
      %c0_27 = arith.constant 0 : index
      %71 = vector.load %arg5[%c0_26, %c0_27] : memref<1x128xf32, #tpu.memory_space<vmem>>, vector<1x128xf32>
      tpu.vector_store %arg5[%c0_26, %c0_27], %70 {strides = array<i32>} : memref<1x128xf32, #tpu.memory_space<vmem>>, vector<1x128xf32>,
    } else {
    }
    %c0 = arith.constant 0 : index
    %c0_1 = arith.constant 0 : index
    %3 = vector.load %arg2[%c0, %c0_1] : memref<10x128xf32, #tpu.memory_space<vmem>>, vector<10x128xf32>
    %c0_2 = arith.constant 0 : index
    %c0_3 = arith.constant 0 : index
    %4 = vector.load %arg3[%c0_2, %c0_3] : memref<1x128xi32, #tpu.memory_space<vmem>>, vector<1x128xi32>
    %5 = tpu.iota {dimensions = array<i32: 0>} : vector<10x128xi32>
    %6 = vector.broadcast %4 : vector<1x128xi32> to vector<10x128xi32>
    %7 = arith.cmpi eq, %5, %6 : vector<10x128xi32>
    %cst = arith.constant dense<0xFF800000> : vector<128xf32>
    %8 = vector.multi_reduction <maximumf>, %3, %cst [0] : vector<10x128xf32> to vector<128xf32>
    %9 = vector.shape_cast %8 : vector<128xf32> to vector<1x128xf32>
    %10 = vector.broadcast %9 : vector<1x128xf32> to vector<10x128xf32>
    %11 = arith.subf %3, %10 : vector<10x128xf32>
    %12 = math.exp %11 : vector<10x128xf32>
    %cst_4 = arith.constant dense<0.000000e+00> : vector<128xf32>
    %13 = vector.multi_reduction <add>, %12, %cst_4 [0] : vector<10x128xf32> to vector<128xf32>
    %14 = vector.shape_cast %13 : vector<128xf32> to vector<1x128xf32>
    %15 = tpu.reciprocal %14 : vector<1x128xf32> -> vector<1x128xf32>
    %16 = vector.broadcast %15 : vector<1x128xf32> to vector<10x128xf32>
    %17 = arith.mulf %12, %16 : vector<10x128xf32>
    %18 = math.log %14 : vector<1x128xf32>
    %19 = vector.broadcast %18 : vector<1x128xf32> to vector<10x128xf32>
    %20 = arith.subf %11, %19 : vector<10x128xf32>
    %cst_5 = arith.constant 0.000000e+00 : f32
    %21 = vector.broadcast %cst_5 : f32 to vector<10x128xf32>
    %22 = arith.select %7, %17, %21 : vector<10x128xi1>, vector<10x128xf32>
    %cst_6 = arith.constant dense<0.000000e+00> : vector<128xf32>
    %23 = vector.multi_reduction <add>, %22, %cst_6 [0] : vector<10x128xf32> to vector<128xf32>
    %24 = vector.shape_cast %23 : vector<128xf32> to vector<1x128xf32>
    %cst_7 = arith.constant 5.000000e-01 : f32
    %25 = vector.broadcast %cst_7 : f32 to vector<1x128xf32>
    %26 = arith.mulf %25, %24 : vector<1x128xf32>
    %cst_8 = arith.constant 5.000000e-01 : f32
    %27 = vector.broadcast %cst_8 : f32 to vector<1x128xf32>
    %28 = arith.addf %27, %26 : vector<1x128xf32>
    %29 = math.log %28 : vector<1x128xf32>
    %cst_9 = arith.constant -0.693147182 : f32
    %30 = vector.broadcast %cst_9 : f32 to vector<10x128xf32>
    %31 = arith.addf %30, %20 : vector<10x128xf32>
    %cst_10 = arith.constant -13.8155107 : f32
    %32 = vector.broadcast %cst_10 : f32 to vector<10x128xf32>
    %33 = arith.maximumf %31, %32 : vector<10x128xf32>
    %34 = vector.shape_cast %29 : vector<1x128xf32> to vector<1x128xf32>
    %35 = vector.broadcast %34 : vector<1x128xf32> to vector<10x128xf32>
    %36 = arith.select %7, %35, %33 : vector<10x128xi1>, vector<10x128xf32>
    %cst_11 = arith.constant 0.000000e+00 : f32
    %37 = vector.broadcast %cst_11 : f32 to vector<1x128xf32>
    %38 = arith.subf %37, %29 : vector<1x128xf32>
    %cst_12 = arith.constant -13.8155107 : f32
    %39 = vector.broadcast %cst_12 : f32 to vector<10x128xf32>
    %40 = arith.maximumf %20, %39 : vector<10x128xf32>
    %cst_13 = arith.constant 0.000000e+00 : f32
    %41 = vector.broadcast %cst_13 : f32 to vector<10x128xf32>
    %42 = arith.cmpf ogt, %17, %41 : vector<10x128xf32>
    %43 = arith.subf %40, %36 : vector<10x128xf32>
    %44 = arith.mulf %17, %43 : vector<10x128xf32>
    %cst_14 = arith.constant 0.000000e+00 : f32
    %45 = vector.broadcast %cst_14 : f32 to vector<10x128xf32>
    %46 = arith.select %42, %44, %45 : vector<10x128xi1>, vector<10x128xf32>
    %cst_15 = arith.constant dense<0.000000e+00> : vector<128xf32>
    %47 = vector.multi_reduction <add>, %46, %cst_15 [0] : vector<10x128xf32> to vector<128xf32>
    %48 = vector.shape_cast %47 : vector<128xf32> to vector<1x128xf32>
    %cst_16 = arith.constant 5.000000e-01 : f32
    %49 = vector.broadcast %cst_16 : f32 to vector<1x128xf32>
    %50 = arith.mulf %49, %38 : vector<1x128xf32>
    %cst_17 = arith.constant 5.000000e-01 : f32
    %51 = vector.broadcast %cst_17 : f32 to vector<1x128xf32>
    %52 = arith.mulf %51, %48 : vector<1x128xf32>
    %53 = arith.addf %50, %52 : vector<1x128xf32>
    %c1_i32 = arith.constant 1 : i32
    %54 = arith.muli %arg0, %c1_i32 : i32
    %55 = arith.addi %54, %arg1 : i32
    %c128_i32 = arith.constant 128 : i32
    %56 = arith.muli %55, %c128_i32 : i32
    %57 = tpu.iota {dimensions = array<i32: 1>} : vector<1x128xi32>
    %58 = vector.broadcast %56 : i32 to vector<1x128xi32>
    %59 = arith.addi %58, %57 : vector<1x128xi32>
    %c0_18 = arith.constant 0 : index
    %c0_19 = arith.constant 0 : index
    %60 = vector.load %arg5[%c0_18, %c0_19] : memref<1x128xf32, #tpu.memory_space<vmem>>, vector<1x128xf32>
    %c12_i32 = arith.constant 12 : i32
    %61 = vector.broadcast %c12_i32 : i32 to vector<1x128xi32>
    %62 = arith.cmpi slt, %59, %61 : vector<1x128xi32>
    %cst_20 = arith.constant 0.000000e+00 : f32
    %63 = vector.broadcast %cst_20 : f32 to vector<1x128xf32>
    %64 = arith.select %62, %53, %63 : vector<1x128xi1>, vector<1x128xf32>
    %65 = arith.addf %60, %64 : vector<1x128xf32>
    %c0_21 = arith.constant 0 : index
    %c0_22 = arith.constant 0 : index
    %66 = vector.load %arg5[%c0_21, %c0_22] : memref<1x128xf32, #tpu.memory_space<vmem>>, vector<1x128xf32>
    tpu.vector_store %arg5[%c0_21, %c0_22], %65 {strides = array<i32>} : memref<1x128xf32, #tpu.memory_space<vmem>>, vector<1x128xf32>,
    %c0_i32_23 = arith.constant 0 : i32
    %67 = arith.cmpi eq, %arg1, %c0_i32_23 : i32
    %68 = arith.extui %67 : i1 to i32
    %c0_i32_24 = arith.constant 0 : i32
    %69 = arith.cmpi ne, %68, %c0_i32_24 : i32
    scf.if %69 {
      %c0_25 = arith.constant 0 : index
      %c0_26 = arith.constant 0 : index
      %70 = vector.load %arg5[%c0_25, %c0_26] : memref<1x128xf32, #tpu.memory_space<vmem>>, vector<1x128xf32>
      %71 = vector.shape_cast %70 : vector<1x128xf32> to vector<1x1x128xf32>
      %cst_27 = arith.constant dense<0.000000e+00> : vector<1xf32>
      %72 = vector.multi_reduction <add>, %71, %cst_27 [1, 2] : vector<1x1x128xf32> to vector<1xf32>
      %73 = vector.shape_cast %72 : vector<1xf32> to vector<1x1x1xf32>
      %74 = vector.extract %73[0, 0, 0] : f32 from vector<1x1x1xf32>
      %cst_28 = arith.constant 0.240449175 : f32
      %75 = arith.mulf %74, %cst_28 : f32
      %76 = tpu.iota {dimensions = array<i32: 1>} : vector<1x128xi32>
      %c0_i32_29 = arith.constant 0 : i32
      %77 = vector.broadcast %c0_i32_29 : i32 to vector<1x128xi32>
      %78 = arith.cmpi eq, %76, %77 : vector<1x128xi32>
      %cst_30 = arith.constant 0.000000e+00 : f32
      %79 = vector.broadcast %75 : f32 to vector<1x128xf32>
      %80 = vector.broadcast %cst_30 : f32 to vector<1x128xf32>
      %81 = arith.select %78, %79, %80 : vector<1x128xi1>, vector<1x128xf32>
      %c0_31 = arith.constant 0 : index
      %c0_32 = arith.constant 0 : index
      %82 = vector.load %arg4[%c0_31, %c0_32] : memref<1x128xf32, #tpu.memory_space<vmem>>, vector<1x128xf32>
      tpu.vector_store %arg4[%c0_31, %c0_32], %81 {strides = array<i32>} : memref<1x128xf32, #tpu.memory_space<vmem>>, vector<1x128xf32>,
    } else {
    }
    return
  }
  func.func @transform_0(%arg0: i32, %arg1: i32) -> (i32, i32) {
    %c1_i32 = arith.constant 1 : i32
    %0 = arith.muli %arg0, %c1_i32 : i32
    %1 = arith.addi %0, %arg1 : i32
    %c0_i32 = arith.constant 0 : i32
    %c0_i32_0 = arith.constant 0 : i32
    return %c0_i32, %1 : i32, i32
  }
  func.func @transform_1(%arg0: i32, %arg1: i32) -> (i32, i32) {
    %c1_i32 = arith.constant 1 : i32
    %0 = arith.muli %arg0, %c1_i32 : i32
    %1 = arith.addi %0, %arg1 : i32
    %c0_i32 = arith.constant 0 : i32
    %c0_i32_0 = arith.constant 0 : i32
    return %c0_i32, %1 : i32, i32
  }
  func.func @transform_2(%arg0: i32, %arg1: i32) -> (i32, i32) {
    %c0_i32 = arith.constant 0 : i32
    %c0_i32_0 = arith.constant 0 : i32
    return %c0_i32, %arg0 : i32, i32
  }
}

</mosaic_0001>

<bundles_post_ra>
// kernel: tpu_custom_call.1
= control target key start
LH: loop header
LB: loop body
LE: loop exit
PB: predicated region body
PF: predicated region fallthrough
CT: control target
= control target key end

     0   :  { %7 = vsyncpa [#allocation4], 0  ;;  %s826_s0 = inlined_call_operand.hbm [shape: f32[10,256], index: 0, kind: input, shape index: {}]   ;;  %s827_s1 = inlined_call_operand.vmem [shape: s32[1,256], index: 1, kind: input, shape index: {}]   ;;  %s828_s2 = inlined_call_operand.hbm [shape: f32[1,256], index: 2, kind: output, shape index: {}]  }
   0x1   :  { %9 = vsyncpa [#allocation4 + $0x1], 0 }
   0x2   :  { %10 = vsyncpa [#allocation5], 0 }
   0x3   :  { %12 = vsyncpa [#allocation5 + $0x1], 0  ;;  %s640_s9 = smov 0   ;;  %s642_s10 = smov 0  }
   0x4   :  { %s644_s11 = smov 0   ;;  %s646_s12 = smov 0  }
   0x5   :  { %s648_s13 = smov 0   ;;  %s650_s14 = smov 0  }
   0x6 LB: > { %s414_s15 = sadd.s32 4294967295, %s617_s14   ;;  %s415_s16 = sadd.s32 4294967294, %s617_s14   ;;  %s617_s14 = sphi %s650_s14, %s18_s14   ;;  %s613_s13 = sphi %s648_s13, %s842_s13   ;;  %s609_s12 = sphi %s646_s12, %s841_s12   ;;  %s605_s11 = sphi %s644_s11, %s840_s11   ;;  %s601_s10 = sphi %s642_s10, %s839_s10   ;;  %s597_s9 = sphi %s640_s9, %s838_s9  }
   0x7   : > { %s30_s17 = sadd.s32 1, %s613_s13  ;;  %s39_s18 = sadd.s32 1, %s605_s11 }
   0x8   : > { %p32_p0 = scmp.ge.s32.totalorder %s30_s17, 2  ;;  %p46_p1 = scmp.ne.s32.totalorder %s605_s11, %s601_s10 }
   0x9   : > { %p47_p2 = scmp.eq.s32.totalorder %s617_s14, 0  ;;  %p52_p3 = scmp.ne.s32.totalorder %s601_s10, %s597_s9 }
   0xa   : > { %s844_s17 = smov (%p32_p0, %s30_s17), 0  ;;  %p53_p5 = scmp.eq.s32.totalorder %s414_s15, 0 }
   0xb   : > { %p681_p4 = por %p47_p2, %p46_p1  ;;  %s36_s20 = ssub.s32 %s613_s13, %s844_s17 }
   0xc   : > { %p104_p6 = scmp.eq.s32.totalorder %s414_s15, 1  ;;  %p37_p7 = scmp.eq.s32.totalorder %s36_s20, 0 }
   0xd   : > { %p687_p8 = por %p53_p5, %p52_p3  ;;  %p110_p10 = scmp.eq.s32.totalorder %s415_s16, 1 }
   0xe   : > { %p691_p9 = por %p104_p6, %p46_p1  ;;  %p441_p13 = scmp.lt.s32.totalorder %s617_s14, 2 }
   0xf   : > { %s696_s23 = scalar_select %p37_p7, %s605_s11, %s39_s18  }
  0x10   : > { %s832_s22 = scalar_select %p691_p9, 1, 0 }
  0x11   : > { %p698_p11 = por %p110_p10, %p52_p3  ;;  %s130_s25 = sand.u32 1, %s605_s11  }
  0x12   : > { %s418_s26 = sshll.u32 %s130_s25, 4  ;;  %s419_s27 = sshll.u32 %s613_s13, 7 }
  0x13   : > { %s833_s24 = scalar_select %p698_p11, 1, 0 }
  0x14   : > { %s709_s30 = scalar_lea.hbm %s826_s0, %s419_s27  ;;  %s134_s3 = scalar_lea.vmem [#allocation3], %s418_s26 }
  0x15   : > { %s141_s4 = sshll.u32 %s134_s3, 4  ;;  %p715_p0 = pnand %p441_p13, %p681_p4  ;;  %s711_s4 = int_to_ptr.vmem [resolvable:$true] %s141_s4 }
  0x16   : > { %s719_s6 = scalar_lea.sflag [#allocation4], %s130_s25  ;;  %s505_s7 = scalar_lea.hbm %s709_s30, 256 }
  0x17   : > { %p506_p1 = scmp.ne.s32.totalorder %s709_s30, %s505_s7  ;;  %p507_p2 = pneg %p715_p0 }
  0x18   : > { %s510_s16 = scalar_lea.hbm %s826_s0, 512  ;;  %p511_p4 = scmp.lt.u32.totalorder %s709_s30, %s826_s0 }
  0x19   : > { %p508_p3 = pnand %p507_p2, %p506_p1  ;;  %p512_p6 = scmp.lt.u32.totalorder %s510_s16, %s505_s7 }
  0x1a   : > { %p514_p10 = scmp.lt.u32.totalorder %s505_s7, %s709_s30 }
  0x1b   : > { %p509_p5 = pneg %p508_p3  ;;  %p513_p7 = por %p512_p6, %p511_p4 }
  0x1d   : > { %p515_p13 = por %p514_p10, %p513_p7 }
  0x1f   : > { %p516_p12 = pnand %p515_p13, %p509_p5 }
  0x21   : > { %519 = shalt.err (!%p516_p12)
}
  0x22   : > { %s520_s20 = scalar_lea.vmem %s711_s4, 256  ;;  %s619_s25 = smov [#allocation3]  }
  0x23   : > { %p521_p1 = scmp.ne.s32.totalorder %s711_s4, %s520_s20  ;;  %s525_s26 = sshll.u32 %s619_s25, 4  ;;  %s526_s26 = int_to_ptr.vmem [resolvable:$false] %s525_s26 }
  0x24   : > { %s527_s27 = scalar_lea.vmem %s526_s26, 512  ;;  %p528_p9 = scmp.lt.s32.totalorder %s711_s4, %s526_s26 }
  0x25   : > { %p523_p3 = pnand %p521_p1, %p507_p2  ;;  %p529_p4 = scmp.lt.s32.totalorder %s527_s27, %s520_s20 }
  0x27   : > { %p524_p11 = pneg %p523_p3  ;;  %p530_p6 = por %p529_p4, %p528_p9 }
  0x29   : > { %p531_p7 = pnand %p530_p6, %p524_p11 }
  0x2b   : > { %534 = shalt.err (!%p531_p7)
}
  0x2c   : > { %s620_s28 = smov 256   ;;  %s621_s29 = smov 128  }
  0x2d   : > { %s622_s3 = smov 8   ;;  %p420_p12 = scmp.ge.s32.totalorder %s617_s14, 1 }
  0x2e   : > { %436 = dma.hbm_to_vmem [thread:$0]  (!%p715_p0), %s709_s30, 256, %s711_s4, %s719_s6, %s620_s28, %s621_s29, %s622_s3  }
  0x2f   : > { %p157_p2 = scmp.lt.s32.totalorder %s617_s14, 3 }
  0x31   : > { %p158_p5 = pnand %p420_p12, %p157_p2 }
  0x32   : > { %s750_s7 = sand.u32 (!%p158_p5), 1, %s601_s10  }
  0x33   : > { %161 = sbr.rel (%p158_p5) target bundleno = 411 (0x19b), region = 28  ;;  %s421_s8 = sshll.u32 (!%p158_p5), %s750_s7, 4 }
  0x34   : > { %s164_s15 = scalar_lea.sflag (!%p158_p5), [#allocation4], %s750_s7  ;;  %s167_s16 = scalar_lea.vmem (!%p158_p5), [#allocation3], %s421_s8 }
  0x3a   : > { %588 = dma.done.wait (%p687_p8), %s164_s15, 256  }
  0x3b   : > { %590 = vsyncadd (%p687_p8), %s164_s15, 4294967040  ;;  %v623_v0 = vmov 0.0   ;;  %vm214_vm0 = vcmask 1041408   ;;  %v202_v1 = vld [vmem:[%s167_s16] sm:$0xff]  ;;  %v203_v2 = vld [vmem:[%s167_s16 + $0x8] sm:$0x3]  ;;  %v205_v24 = vlaneseq }
  0x3c   : > { %201 = vst [vmem:[#allocation2] sm:$0x1] %v623_v0  ;;  %v215_v3 = vsel %vm214_vm0, %v203_v2, -inf  ;;  %p193_p8 = scmp.lt.s32.totalorder %s609_s12, 1  ;;  %s423_s6 = sshll.u32 %s609_s12, 7  ;;  %vm301_vm6 = vcmask 1040384  }
  0x3d   : > { %v216_v4 = vmax.f32 %v202_v1, %v215_v3  ;;  %v206_v26 = vshrl.u32 %v205_v24, 7  ;;  %s424_s18 = sshll.u32 %s609_s12, 4  ;;  %s190_s20 = scalar_lea.vmem [#allocation6], %s750_s7 }
  0x3e   : > { %s194_s21 = scalar_select %p193_p8, %s609_s12, 1 }
  0x3f   : > { %v217_v5 = vrot.slane %v216_v4, 4  ;;  %v207_v27 = vadd.s32 8, %v206_v26  ;;  %s330_s25 = sshll.u32 %s190_s20, 4  ;;  %s777_s29 = scalar_lea.hbm %s828_s2, %s424_s18  ;;  %s779_s25 = int_to_ptr.vmem [resolvable:$true] %s330_s25 }
  0x40   : > { %s195_s5 = scalar_lea.vmem %s827_s1, %s194_s21  ;;  %s318_s3 = scalar_lea.sflag [#allocation5], %s750_s7 }
  0x41   : > { %v218_v6 = vmax.f32 %v216_v4, %v217_v5  ;;  %v422_v28 = vld [vmem:[%s195_s5] ss:$0 sm:$0xff]  ;;  %v289_v5 = vand.u32 127, %v205_v24  ;;  %s535_s12 = scalar_lea.vmem %s779_s25, 16  ;;  %p835_p11 = scmp.ne.s32.totalorder %s832_s22, 0 }
  0x42   : > { %vm212_vm1 = vcmp.eq.s32.totalorder %v206_v26, %v422_v28  ;;  %vm213_vm2 = vcmp.eq.s32.totalorder %v207_v27, %v422_v28  ;;  %p536_p9 = scmp.ne.s32.totalorder %s779_s25, %s535_s12  ;;  %s624_s8 = smov [#allocation6]  }
  0x43   : > { %v219_v7 = vrot.slane %v218_v6, 2  ;;  %vm313_vm7 = vcmp.eq.s32.totalorder %v289_v5, 0  ;;  %s539_s15 = sshll.u32 %s624_s8, 4  ;;  %s540_s15 = int_to_ptr.vmem [resolvable:$false] %s539_s15 }
  0x44   : > { %p537_p0 = pnand %p536_p9, %p835_p11  ;;  %s541_s16 = scalar_lea.vmem %s540_s15, 32 }
  0x45   : > { %v220_v8 = vmax.f32 %v218_v6, %v219_v7  ;;  %p542_p13 = scmp.lt.s32.totalorder %s779_s25, %s540_s15  ;;  %p543_p1 = scmp.lt.s32.totalorder %s541_s16, %s535_s12 }
  0x46   : > { %p538_p10 = pneg %p537_p0 }
  0x47   : > { %v221_v9 = vrot.slane %v220_v8, 1  ;;  %p544_p3 = por %p543_p1, %p542_p13 }
  0x49   : > { %v222_v10 = vmax.f32 %v220_v8, %v221_v9  ;;  %v290_v8 = vstv %s423_s6  ;;  %p545_p4 = pnand %p544_p3, %p538_p10 }
  0x4b   : > { %v223_v11 = vsub.f32 %v202_v1, %v222_v10  ;;  %v224_v12 = vsub.f32 %v203_v2, %v222_v10  ;;  %v291_v10 = vadd.s32 %v290_v8, %v289_v5 }
  0x4d   : > { %v225_v13 = vmul.f32 1.442695, %v223_v11  ;;  %v227_v14 = vmul.f32 1.442695, %v224_v12  ;;  %vm293_vm5 = vcmp.lt.s32.totalorder %v291_v10, 12 }
  0x4f   : > { %495 = vpow2.f32 %v225_v13 }
  0x50   : > { %497 = vpow2.f32 %v227_v14 }
  0x59   : > { %v496_v15 = vpop.eup %495 }
  0x5a   : > { %v498_v16 = vpop.eup %497 }
  0x5b   : > { %v229_v17 = vsel %vm214_vm0, %v498_v16, 0.0 }
  0x5c   : > { %v230_v18 = vadd.f32 %v496_v15, %v229_v17 }
  0x5e   : > { %v231_v19 = vrot.slane %v230_v18, 4 }
  0x60   : > { %v232_v20 = vadd.f32 %v231_v19, %v230_v18 }
  0x62   : > { %v233_v21 = vrot.slane %v232_v20, 2 }
  0x64   : > { %v234_v22 = vadd.f32 %v233_v21, %v232_v20 }
  0x66   : > { %v235_v23 = vrot.slane %v234_v22, 1 }
  0x68   : > { %v236_v25 = vadd.f32 %v235_v23, %v234_v22 }
  0x6a   : > { %499 = vrcp.f32 %v236_v25 }
  0x6b   : > { %501 = vlog2.f32 %v236_v25 }
  0x74   : > { %v500_v29 = vpop.eup %499 }
  0x75   : > { %v238_v30 = vmul.f32 %v500_v29, %v496_v15  ;;  %v239_v31 = vmul.f32 %v500_v29, %v498_v16  ;;  %v502_v41 = vpop.eup %501  ;;  %v292_v15 = vld [vmem:[#allocation2] sm:$0x1] }
  0x76   : > { %v241_v44 = vmul.f32 0.6931472, %v502_v41 }
  0x77   : > { %v244_v32 = vsel %vm212_vm1, %v238_v30, 0.0  ;;  %v245_v33 = vsel %vm213_vm2, %v239_v31, 0.0  ;;  %vm267_vm3 = vcmp.gt.f32.partialorder %v238_v30, 0.0  ;;  %vm268_vm4 = vcmp.gt.f32.partialorder %v239_v31, 0.0 }
  0x78   : > { %v246_v34 = vsel %vm214_vm0, %v245_v33, 0.0  ;;  %v242_v46 = vsub.f32 %v223_v11, %v241_v44  ;;  %v243_v47 = vsub.f32 %v224_v12, %v241_v44 }
  0x79   : > { %v247_v35 = vadd.f32 %v246_v34, %v244_v32 }
  0x7a   : > { %v258_v48 = vadd.f32 -0.6931472, %v242_v46  ;;  %v259_v49 = vadd.f32 -0.6931472, %v243_v47  ;;  %v265_v53 = vmax.f32 %v242_v46, -13.815511 }
  0x7b   : > { %v248_v36 = vrot.slane %v247_v35, 4  ;;  %v266_v54 = vmax.f32 %v243_v47, -13.815511 }
  0x7c   : > { %v260_v50 = vmax.f32 %v258_v48, -13.815511  ;;  %v261_v51 = vmax.f32 %v259_v49, -13.815511 }
  0x7d   : > { %v249_v37 = vadd.f32 %v248_v36, %v247_v35 }
  0x7f   : > { %v250_v38 = vrot.slane %v249_v37, 2 }
  0x81   : > { %v251_v39 = vadd.f32 %v250_v38, %v249_v37 }
  0x83   : > { %v252_v40 = vrot.slane %v251_v39, 1 }
  0x85   : > { %v253_v42 = vadd.f32 %v252_v40, %v251_v39 }
  0x87   : > { %v254_v43 = vmul.f32 0.5, %v253_v42 }
  0x89   : > { %v255_v45 = vadd.f32 0.5, %v254_v43 }
  0x8b   : > { %503 = vlog2.f32 %v255_v45 }
  0x95   : > { %v504_v52 = vpop.eup %503 }
  0x96   : > { %v257_v55 = vmul.f32 0.6931472, %v504_v52 }
  0x98   : > { %v262_v56 = vsel %vm212_vm1, %v257_v55, %v260_v50  ;;  %v263_v57 = vsel %vm213_vm2, %v257_v55, %v261_v51  ;;  %v264_v6 = vsub.f32 0.0, %v257_v55 }
  0x99   : > { %v269_v58 = vsub.f32 %v265_v53, %v262_v56  ;;  %v270_v59 = vsub.f32 %v266_v54, %v263_v57 }
  0x9a   : > { %v283_v12 = vmul.f32 0.5, %v264_v6 }
  0x9b   : > { %v271_v60 = vmul.f32 %v269_v58, %v238_v30  ;;  %v272_v61 = vmul.f32 %v270_v59, %v239_v31 }
  0x9d   : > { %v273_v62 = vsel %vm267_vm3, %v271_v60, 0.0  ;;  %v274_v63 = vsel %vm268_vm4, %v272_v61, 0.0 }
  0x9e   : > { %v275_v0 = vsel %vm214_vm0, %v274_v63, 0.0 }
  0x9f   : > { %v276_v1 = vadd.f32 %v275_v0, %v273_v62 }
  0xa1   : > { %v277_v2 = vrot.slane %v276_v1, 4 }
  0xa3   : > { %v278_v3 = vadd.f32 %v277_v2, %v276_v1 }
  0xa5   : > { %v279_v4 = vrot.slane %v278_v3, 2 }
  0xa7   : > { %v280_v7 = vadd.f32 %v279_v4, %v278_v3 }
  0xa9   : > { %v281_v9 = vrot.slane %v280_v7, 1 }
  0xab   : > { %v282_v11 = vadd.f32 %v281_v9, %v280_v7 }
  0xad   : > { %v284_v13 = vmul.f32 0.5, %v282_v11 }
  0xaf   : > { %v285_v14 = vadd.f32 %v284_v13, %v283_v12 }
  0xb1   : > { %v294_v16 = vsel %vm293_vm5, %v285_v14, 0.0 }
  0xb2   : > { %v295_v17 = vadd.f32 %v294_v16, %v292_v15 }
  0xb4   : > { %296 = vst [vmem:[#allocation2] sm:$0x1] %v295_v17 }
  0xbb   : > { %v300_v18 = vld [vmem:[#allocation2] sm:$0x1] }
  0xbc   : > { %v302_v19 = vsel %vm301_vm6, %v300_v18, 0.0 }
  0xbd   : > { %303 = vadd.xlane.f32.xlu0 %v302_v19 }
 0x14a   : > { %v304_v20 = vpop.xlane.xlu0 %303 }
 0x14b   : > { %v305_v21 = vrot.slane %v304_v20, 4 }
 0x14d   : > { %v306_v22 = vadd.f32 %v305_v21, %v304_v20 }
 0x14f   : > { %v307_v23 = vrot.slane %v306_v22, 2 }
 0x151   : > { %v308_v24 = vadd.f32 %v307_v23, %v306_v22 }
 0x153   : > { %v309_v25 = vrot.slane %v308_v24, 1 }
 0x155   : > { %v310_v26 = vadd.f32 %v309_v25, %v308_v24 }
 0x157   : > { %427 = vpush %v310_v26 }
 0x188   : > { %s428_s19 = spop %427 }
 0x189   : > { %s312_s26 = smul.f32 0.24044918, %s428_s19 }
 0x18b   : > { %v314_v27 = vstv %s312_s26 }
 0x18c   : > { %v315_v28 = vsel %vm313_vm7, %v314_v27, 0.0 }
 0x18d   : > { %316 = vst [vmem:[%s190_s20] sm:$0x1] %v315_v28 }
 0x18e   : > { %548 = shalt.err (!%p545_p4)
}
 0x18f   : > { %s549_s7 = scalar_lea.hbm %s777_s29, 16  ;;  %s553_s4 = scalar_lea.hbm %s828_s2, 32 }
 0x190   : > { %p550_p6 = scmp.ne.s32.totalorder %s777_s29, %s549_s7  ;;  %p554_p2 = scmp.lt.u32.totalorder %s777_s29, %s828_s2 }
 0x191   : > { %p555_p5 = scmp.lt.u32.totalorder %s553_s4, %s549_s7  ;;  %p557_p9 = scmp.lt.u32.totalorder %s549_s7, %s777_s29 }
 0x192   : > { %p551_p7 = pnand %p550_p6, %p835_p11 }
 0x193   : > { %p556_p8 = por %p555_p5, %p554_p2 }
 0x194   : > { %p552_p12 = pneg %p551_p7 }
 0x195   : > { %p558_p0 = por %p557_p9, %p556_p8 }
 0x197   : > { %p559_p10 = pnand %p558_p0, %p552_p12 }
 0x199   : > { %562 = shalt.err (!%p559_p10)
}
 0x19a   : > { %431 = dma.vmem_to_hbm [thread:$0]  (%p835_p11), %s779_s25, 16, %s777_s29, %s318_s3  }
 0x19b PF: > { %s342_s18 = sand.u32 1, %s597_s9   ;;  %p836_p13 = scmp.ne.s32.totalorder %s833_s24, 0 }
 0x19c   : > { %p837_p1 = scmp.ge.s32.totalorder %s617_s14, 2  ;;  %s343_s19 = scalar_lea.sflag [#allocation5], %s342_s18 }
 0x19e   : > { %p438_p3 = pnand %p837_p1, %p836_p13 }
 0x1a0   : > { %592 = dma.done.wait (!%p438_p3), %s343_s19, 16  }
 0x1a1   : > { %594 = vsyncadd (!%p438_p3), %s343_s19, 4294967280  ;;  %s18_s14 = sadd.s32 1, %s617_s14   ;;  %s838_s9 = smov %s601_s10 }
 0x1a2   : > { %p15_p4 = scmp.ge.s32.totalorder %s18_s14, 4   ;;  %s839_s10 = smov %s605_s11 }
 0x1a3   : > { %s840_s11 = smov %s696_s23  ;;  %s841_s12 = smov %s613_s13 }
 0x1a4   : > { %s842_s13 = smov %s844_s17  ;;  %17 = sbr.rel (!%p15_p4) target bundleno = 6 (0x6), region = 84 }
 0x1ab   :  { %347 = vsyncpa [#allocation4], 1 }
 0x1ac   :  { %349 = vsyncpa [#allocation4 + $0x1], 1 }
 0x1ad   :  { %350 = vsyncpa [#allocation5], 1 }
 0x1ae   :  { %352 = vsyncpa [#allocation5 + $0x1], 1 }

</bundles_post_ra>
